<compile_context>
chip_gen: v6e
topology: v6e:2x2x1
jax: 0.10.0
libtpu: 0.0.40
codegen_flags: <defaults>
</compile_context>

<pallas_src>
import functools

import jax
import jax.numpy as jnp
from jax.experimental import pallas as pl
from jax.experimental.pallas import tpu as pltpu

LOG_STD_MAX = 2.0
LOG_STD_MIN = -5.0

IN_DIM = 8
HIDDEN = 256
OUT_DIM = 1
HEAD_PAD = 128  # lane-dense output slab width; col 0 = mean, col 1 = log_std


def _round_up(n, m):
    return ((n + m - 1) // m) * m


def actor_kernel(x_ref, w1_ref, b1_ref, w2_ref, b2_ref, wh_ref, bh_ref, out_ref):
    # fc1 + ReLU (accumulate in f32; epilogue stays f32 -- v5e has no bf16 VPU/EUP).
    x = x_ref[...].astype(w1_ref.dtype)
    h1 = jnp.dot(x, w1_ref[...], preferred_element_type=jnp.float32) + b1_ref[...]
    h1 = jnp.maximum(h1, 0.0)

    # fc2 + ReLU
    h2 = jnp.dot(h1.astype(w2_ref.dtype), w2_ref[...],
                 preferred_element_type=jnp.float32) + b2_ref[...]
    h2 = jnp.maximum(h2, 0.0)

    # Fused heads: one (HIDDEN, 128) matmul; column 0 = mean, column 1 = log_std,
    # remaining columns are zero padding (sliced off by the caller).
    heads = jnp.dot(h2.astype(wh_ref.dtype), wh_ref[...],
                    preferred_element_type=jnp.float32) + bh_ref[...]

    # tanh squash + affine remap applied ONLY to the log_std lane (column 1).
    lane = jax.lax.broadcasted_iota(jnp.int32, heads.shape, dimension=1)
    squashed = LOG_STD_MIN + 0.5 * (LOG_STD_MAX - LOG_STD_MIN) * (jnp.tanh(heads) + 1.0)
    out_ref[...] = jnp.where(lane == 1, squashed, heads).astype(out_ref.dtype)


@functools.partial(jax.jit, static_argnames=("b_blk", "matmul_dtype"))
def actor_forward(x, params, *, b_blk=256, matmul_dtype=jnp.float32):
    """x: (B, 8) float32 -> (mean (B, 1), log_std (B, 1))."""
    w1, b1, w2, b2, wm, bm, ws, bs = params
    B = x.shape[0]

    # Fuse the two (HIDDEN, 1) heads into one lane-dense (HIDDEN, 128) weight.
    wh = jnp.pad(jnp.concatenate([wm, ws], axis=1), ((0, 0), (0, HEAD_PAD - 2)))
    bh = jnp.pad(jnp.concatenate([bm, bs]).reshape(1, 2), ((0, 0), (0, HEAD_PAD - 2)))

    # Weights at rest in the matmul dtype (bf16 on v6e/v7x for the MXU);
    # biases stay f32 because they are added to the f32 accumulator.
    w1c = w1.astype(matmul_dtype)
    w2c = w2.astype(matmul_dtype)
    whc = wh.astype(matmul_dtype)
    b1r = b1.reshape(1, HIDDEN).astype(jnp.float32)
    b2r = b2.reshape(1, HIDDEN).astype(jnp.float32)
    bhr = bh.astype(jnp.float32)

    # Batch tiling: modest tile keeps activation intermediates small (v7x VMEM is
    # 64 MiB), while the constant index_map keeps the ~130-260 KB of weights
    # resident in VMEM across all grid steps.
    blk = min(b_blk, _round_up(B, 8))
    B_pad = _round_up(B, blk)
    if B_pad != B:
        x = jnp.pad(x, ((0, B_pad - B), (0, 0)))
    grid = (B_pad // blk,)

    def const(shape):
        return pl.BlockSpec(shape, lambda i: (0, 0))

    slab = pl.pallas_call(
        actor_kernel,
        out_shape=jax.ShapeDtypeStruct((B_pad, HEAD_PAD), jnp.float32),
        grid=grid,
        in_specs=[
            pl.BlockSpec((blk, IN_DIM), lambda i: (i, 0)),   # x: tiled over batch
            const((IN_DIM, HIDDEN)),                         # w1 (resident)
            const((1, HIDDEN)),                              # b1
            const((HIDDEN, HIDDEN)),                         # w2
            const((1, HIDDEN)),                              # b2
            const((HIDDEN, HEAD_PAD)),                       # fused head weight
            const((1, HEAD_PAD)),                            # fused head bias
        ],
        out_specs=pl.BlockSpec((blk, HEAD_PAD), lambda i: (i, 0)),
        compiler_params=pltpu.CompilerParams(
            dimension_semantics=("parallel",)),              # v7x: shard tiles over 2 TCs
    )(x, w1c, b1r, w2c, b2r, whc, bhr)

    mean = slab[:B, 0:1]
    log_std = slab[:B, 1:2]
    return mean, log_std


def init_params(key):
    ks = jax.random.split(key, 8)

    def lin(kw, kb, fan_in, fan_out):
        bound = 1.0 / jnp.sqrt(fan_in)
        w = jax.random.uniform(kw, (fan_in, fan_out), jnp.float32, -bound, bound)
        b = jax.random.uniform(kb, (fan_out,), jnp.float32, -bound, bound)
        return w, b

    w1, b1 = lin(ks[0], ks[1], IN_DIM, HIDDEN)
    w2, b2 = lin(ks[2], ks[3], HIDDEN, HIDDEN)
    wm, bm = lin(ks[4], ks[5], HIDDEN, OUT_DIM)
    ws, bs = lin(ks[6], ks[7], HIDDEN, OUT_DIM)
    return (w1, b1, w2, b2, wm, bm, ws, bs)


def actor_forward_ref(x, params):
    w1, b1, w2, b2, wm, bm, ws, bs = params
    h = jnp.maximum(x @ w1 + b1, 0.0)
    h = jnp.maximum(h @ w2 + b2, 0.0)
    mean = h @ wm + bm
    ls = jnp.tanh(h @ ws + bs)
    ls = LOG_STD_MIN + 0.5 * (LOG_STD_MAX - LOG_STD_MIN) * (ls + 1.0)
    return mean, ls


# TODO(synk): get_action() (reparameterized sampling, log_prob, action squash) is not
# part of forward() and is left to the host-side JAX code.

if __name__ == "__main__":
    key = jax.random.PRNGKey(0)
    kx, kp = jax.random.split(key)
    params = init_params(kp)

    # Small-batch path (single grid step).
    B = 8
    x = jax.random.normal(kx, (B, IN_DIM), jnp.float32)
    mean, log_std = actor_forward(x, params)
    jax.block_until_ready((mean, log_std))
    mean_r, ls_r = actor_forward_ref(x, params)
    assert mean.shape == (B, 1) and log_std.shape == (B, 1)
    assert jnp.allclose(mean, mean_r, atol=1e-5, rtol=1e-5)
    assert jnp.allclose(log_std, ls_r, atol=1e-5, rtol=1e-5)

    # Multi-tile path with a ragged batch (exercises the grid + tail padding).
    B2 = 300
    x2 = jax.random.normal(jax.random.PRNGKey(1), (B2, IN_DIM), jnp.float32)
    mean2, ls2 = actor_forward(x2, params, b_blk=128)
    jax.block_until_ready((mean2, ls2))
    mean2_r, ls2_r = actor_forward_ref(x2, params)
    assert mean2.shape == (B2, 1) and ls2.shape == (B2, 1)
    assert jnp.allclose(mean2, mean2_r, atol=1e-5, rtol=1e-5)
    assert jnp.allclose(ls2, ls2_r, atol=1e-5, rtol=1e-5)

    # bf16 matmul operands (v6e/v7x MXU-native), f32 epilogue; looser tolerance.
    mean_b, ls_b = actor_forward(x, params, matmul_dtype=jnp.bfloat16)
    jax.block_until_ready((mean_b, ls_b))
    assert jnp.allclose(mean_b, mean_r, atol=1e-1, rtol=1e-1)
    assert jnp.allclose(ls_b, ls_r, atol=1e-1, rtol=1e-1)

    print("KERNEL_OK")
</pallas_src>

<mosaic_0001>
module attributes {stable_mosaic.version = 11 : i64} {
  func.func @actor_kernel(%arg0: i32, %arg1: memref<8x8xf32, #tpu.memory_space<vmem>>, %arg2: memref<8x256xf32, #tpu.memory_space<vmem>>, %arg3: memref<1x256xf32, #tpu.memory_space<vmem>>, %arg4: memref<256x256xf32, #tpu.memory_space<vmem>>, %arg5: memref<1x256xf32, #tpu.memory_space<vmem>>, %arg6: memref<256x128xf32, #tpu.memory_space<vmem>>, %arg7: memref<1x128xf32, #tpu.memory_space<vmem>>, %arg8: memref<8x128xf32, #tpu.memory_space<vmem>>) attributes {dimension_semantics = [#tpu.dimension_semantics<parallel>], iteration_bounds = array<i64: 1>, scalar_prefetch = 0 : i64, scratch_operands = 0 : i64, tpu.core_type = #tpu.core_type<tc>, window_params = [{transform_indices = @transform_0, window_bounds = array<i64: 8, 8>}, {pipeline_mode = #tpu.pipeline_mode<synchronous>, transform_indices = @transform_1, window_bounds = array<i64: 8, 256>}, {pipeline_mode = #tpu.pipeline_mode<synchronous>, transform_indices = @transform_2, window_bounds = array<i64: 1, 256>}, {pipeline_mode = #tpu.pipeline_mode<synchronous>, transform_indices = @transform_3, window_bounds = array<i64: 256, 256>}, {pipeline_mode = #tpu.pipeline_mode<synchronous>, transform_indices = @transform_4, window_bounds = array<i64: 1, 256>}, {pipeline_mode = #tpu.pipeline_mode<synchronous>, transform_indices = @transform_5, window_bounds = array<i64: 256, 128>}, {pipeline_mode = #tpu.pipeline_mode<synchronous>, transform_indices = @transform_6, window_bounds = array<i64: 1, 128>}, {transform_indices = @transform_7, window_bounds = array<i64: 8, 128>}]} {
    %c0 = arith.constant 0 : index
    %c0_0 = arith.constant 0 : index
    %0 = vector.load %arg1[%c0, %c0_0] : memref<8x8xf32, #tpu.memory_space<vmem>>, vector<8x8xf32>
    %c0_1 = arith.constant 0 : index
    %c0_2 = arith.constant 0 : index
    %1 = vector.load %arg2[%c0_1, %c0_2] : memref<8x256xf32, #tpu.memory_space<vmem>>, vector<8x256xf32>
    %cst = arith.constant dense<0.000000e+00> : vector<8x256xf32>
    %2 = tpu.matmul %0, %1, %cst {dimension_numbers = #tpu.dot_dimension_numbers<[1], [0], [0], [1], [0, 0, 1, 1], [], []>} : vector<8x8xf32>, vector<8x256xf32>, vector<8x256xf32> -> vector<8x256xf32>
    %c0_3 = arith.constant 0 : index
    %c0_4 = arith.constant 0 : index
    %3 = vector.load %arg3[%c0_3, %c0_4] : memref<1x256xf32, #tpu.memory_space<vmem>>, vector<1x256xf32>
    %4 = vector.broadcast %3 : vector<1x256xf32> to vector<8x256xf32>
    %5 = arith.addf %2, %4 : vector<8x256xf32>
    %cst_5 = arith.constant 0.000000e+00 : f32
    %6 = vector.broadcast %cst_5 : f32 to vector<8x256xf32>
    %7 = arith.maximumf %5, %6 : vector<8x256xf32>
    %c0_6 = arith.constant 0 : index
    %c0_7 = arith.constant 0 : index
    %8 = vector.load %arg4[%c0_6, %c0_7] : memref<256x256xf32, #tpu.memory_space<vmem>>, vector<256x256xf32>
    %cst_8 = arith.constant dense<0.000000e+00> : vector<8x256xf32>
    %9 = tpu.matmul %7, %8, %cst_8 {dimension_numbers = #tpu.dot_dimension_numbers<[1], [0], [0], [1], [0, 0, 1, 1], [], []>} : vector<8x256xf32>, vector<256x256xf32>, vector<8x256xf32> -> vector<8x256xf32>
    %c0_9 = arith.constant 0 : index
    %c0_10 = arith.constant 0 : index
    %10 = vector.load %arg5[%c0_9, %c0_10] : memref<1x256xf32, #tpu.memory_space<vmem>>, vector<1x256xf32>
    %11 = vector.broadcast %10 : vector<1x256xf32> to vector<8x256xf32>
    %12 = arith.addf %9, %11 : vector<8x256xf32>
    %cst_11 = arith.constant 0.000000e+00 : f32
    %13 = vector.broadcast %cst_11 : f32 to vector<8x256xf32>
    %14 = arith.maximumf %12, %13 : vector<8x256xf32>
    %c0_12 = arith.constant 0 : index
    %c0_13 = arith.constant 0 : index
    %15 = vector.load %arg6[%c0_12, %c0_13] : memref<256x128xf32, #tpu.memory_space<vmem>>, vector<256x128xf32>
    %cst_14 = arith.constant dense<0.000000e+00> : vector<8x128xf32>
    %16 = tpu.matmul %14, %15, %cst_14 {dimension_numbers = #tpu.dot_dimension_numbers<[1], [0], [0], [1], [0, 0, 1, 1], [], []>} : vector<8x256xf32>, vector<256x128xf32>, vector<8x128xf32> -> vector<8x128xf32>
    %c0_15 = arith.constant 0 : index
    %c0_16 = arith.constant 0 : index
    %17 = vector.load %arg7[%c0_15, %c0_16] : memref<1x128xf32, #tpu.memory_space<vmem>>, vector<1x128xf32>
    %18 = vector.broadcast %17 : vector<1x128xf32> to vector<8x128xf32>
    %19 = arith.addf %16, %18 : vector<8x128xf32>
    %20 = tpu.iota {dimensions = array<i32: 1>} : vector<8x128xi32>
    %21 = math.tanh %19 : vector<8x128xf32>
    %cst_17 = arith.constant 1.000000e+00 : f32
    %22 = vector.broadcast %cst_17 : f32 to vector<8x128xf32>
    %23 = arith.addf %21, %22 : vector<8x128xf32>
    %cst_18 = arith.constant 3.500000e+00 : f32
    %24 = vector.broadcast %cst_18 : f32 to vector<8x128xf32>
    %25 = arith.mulf %24, %23 : vector<8x128xf32>
    %cst_19 = arith.constant -5.000000e+00 : f32
    %26 = vector.broadcast %cst_19 : f32 to vector<8x128xf32>
    %27 = arith.addf %26, %25 : vector<8x128xf32>
    %c1_i32 = arith.constant 1 : i32
    %28 = vector.broadcast %c1_i32 : i32 to vector<8x128xi32>
    %29 = arith.cmpi eq, %20, %28 : vector<8x128xi32>
    %30 = arith.select %29, %27, %19 : vector<8x128xi1>, vector<8x128xf32>
    %c0_20 = arith.constant 0 : index
    %c0_21 = arith.constant 0 : index
    %31 = vector.load %arg8[%c0_20, %c0_21] : memref<8x128xf32, #tpu.memory_space<vmem>>, vector<8x128xf32>
    tpu.vector_store %arg8[%c0_20, %c0_21], %30 {strides = array<i32>} : memref<8x128xf32, #tpu.memory_space<vmem>>, vector<8x128xf32>,
    return
  }
  func.func @transform_0(%arg0: i32) -> (i32, i32) {
    %c0_i32 = arith.constant 0 : i32
    %c0_i32_0 = arith.constant 0 : i32
    return %arg0, %c0_i32 : i32, i32
  }
  func.func @transform_1(%arg0: i32) -> (i32, i32) {
    %c0_i32 = arith.constant 0 : i32
    %c0_i32_0 = arith.constant 0 : i32
    %c0_i32_1 = arith.constant 0 : i32
    return %c0_i32, %c0_i32_0 : i32, i32
  }
  func.func @transform_2(%arg0: i32) -> (i32, i32) {
    %c0_i32 = arith.constant 0 : i32
    %c0_i32_0 = arith.constant 0 : i32
    %c0_i32_1 = arith.constant 0 : i32
    return %c0_i32, %c0_i32_0 : i32, i32
  }
  func.func @transform_3(%arg0: i32) -> (i32, i32) {
    %c0_i32 = arith.constant 0 : i32
    %c0_i32_0 = arith.constant 0 : i32
    %c0_i32_1 = arith.constant 0 : i32
    return %c0_i32, %c0_i32_0 : i32, i32
  }
  func.func @transform_4(%arg0: i32) -> (i32, i32) {
    %c0_i32 = arith.constant 0 : i32
    %c0_i32_0 = arith.constant 0 : i32
    %c0_i32_1 = arith.constant 0 : i32
    return %c0_i32, %c0_i32_0 : i32, i32
  }
  func.func @transform_5(%arg0: i32) -> (i32, i32) {
    %c0_i32 = arith.constant 0 : i32
    %c0_i32_0 = arith.constant 0 : i32
    %c0_i32_1 = arith.constant 0 : i32
    return %c0_i32, %c0_i32_0 : i32, i32
  }
  func.func @transform_6(%arg0: i32) -> (i32, i32) {
    %c0_i32 = arith.constant 0 : i32
    %c0_i32_0 = arith.constant 0 : i32
    %c0_i32_1 = arith.constant 0 : i32
    return %c0_i32, %c0_i32_0 : i32, i32
  }
  func.func @transform_7(%arg0: i32) -> (i32, i32) {
    %c0_i32 = arith.constant 0 : i32
    %c0_i32_0 = arith.constant 0 : i32
    return %arg0, %c0_i32 : i32, i32
  }
}

</mosaic_0001>

<bundles_post_ra>
// kernel: actor_forward.1
= control target key start
LH: loop header
LB: loop body
LE: loop exit
PB: predicated region body
PF: predicated region fallthrough
CT: control target
= control target key end

     0   :  { %v429_v2 = vmov 0.0   ;;  %vm41_vm0 = vcmask 64512   ;;  %s779_s1 = inlined_call_operand.vmem [shape: f32[8,256], index: 1, kind: input, shape index: {}]   ;;  %s780_s0 = inlined_call_operand.vmem [shape: f32[8,8], index: 0, kind: input, shape index: {}]   ;;  %s781_s3 = inlined_call_operand.vmem [shape: f32[256,256], index: 3, kind: input, shape index: {}]   ;;  %s782_s5 = inlined_call_operand.vmem [shape: f32[256,128], index: 5, kind: input, shape index: {}]   ;;  %s783_s2 = inlined_call_operand.vmem [shape: f32[1,256], index: 2, kind: input, shape index: {}]   ;;  %s784_s4 = inlined_call_operand.vmem [shape: f32[1,256], index: 4, kind: input, shape index: {}]   ;;  %s785_s6 = inlined_call_operand.vmem [shape: f32[1,128], index: 6, kind: input, shape index: {}]   ;;  %s786_s7 = inlined_call_operand.vmem [shape: f32[8,128], index: 7, kind: output, shape index: {}]  }
   0x1   :  { %v28_v0 = vld [vmem:[%s779_s1 + $0x8] sm:$0xff]  ;;  %v27_v1 = vld [vmem:[%s779_s1] sm:$0xff]  ;;  %109 = vmatprep.mubr.f32.mxu0 %v429_v2  ;;  %v149_v4 = vld [vmem:[%s781_s3 + $0xf8] sm:$0xff] }
   0x2   :  { %v26_v3 = vld [vmem:[%s780_s0] sm:$0xff]  ;;  %75 = vmatprep.subr.mxu0 %v28_v0  ;;  %v148_v5 = vld [vmem:[%s781_s3 + $0xf0] sm:$0xff]  ;;  %v147_v6 = vld [vmem:[%s781_s3 + $0xe8] sm:$0xff]  ;;  %194 = vmatprep.subr.mxu1 %v149_v4 }
   0x3   :  { %76 = vmatpush1.msra.mxu0 %v27_v1  ;;  %v146_v7 = vld [vmem:[%s781_s3 + $0xe0] sm:$0xff]  ;;  %195 = vmatpush1.msra.mxu1 %v148_v5  ;;  %v145_v8 = vld [vmem:[%s781_s3 + $0xd8] sm:$0xff]  ;;  %v144_v9 = vld [vmem:[%s781_s3 + $0xd0] sm:$0xff] }
   0x4   :  { %389 = vmatmul.mubr.msk.f32.vlgmr.msra.gmra.mxu0 %vm41_vm0, %v26_v3  ;;  %196 = vmatprep.subr.mxu1 %v147_v6  ;;  %v143_v10 = vld [vmem:[%s781_s3 + $0xc8] sm:$0xff]  ;;  %v142_v11 = vld [vmem:[%s781_s3 + $0xc0] sm:$0xff]  ;;  %v141_v12 = vld [vmem:[%s781_s3 + $0xb8] sm:$0xff] }
   0x5   :  { %197 = vmatpush1.msra.mxu1 %v146_v7  ;;  %v140_v13 = vld [vmem:[%s781_s3 + $0xb0] sm:$0xff]  ;;  %v139_v14 = vld [vmem:[%s781_s3 + $0xa8] sm:$0xff]  ;;  %v138_v15 = vld [vmem:[%s781_s3 + $0xa0] sm:$0xff] }
   0x6   :  { %198 = vmatprep.subr.mxu1 %v145_v8  ;;  %v137_v16 = vld [vmem:[%s781_s3 + $0x98] sm:$0xff]  ;;  %v136_v17 = vld [vmem:[%s781_s3 + $0x90] sm:$0xff]  ;;  %v135_v18 = vld [vmem:[%s781_s3 + $0x88] sm:$0xff] }
   0x7   :  { %199 = vmatpush1.msra.mxu1 %v144_v9  ;;  %v134_v19 = vld [vmem:[%s781_s3 + $0x80] sm:$0xff]  ;;  %v133_v20 = vld [vmem:[%s781_s3 + $0x78] sm:$0xff]  ;;  %v132_v21 = vld [vmem:[%s781_s3 + $0x70] sm:$0xff] }
   0x8   :  { %200 = vmatprep.subr.mxu1 %v143_v10  ;;  %v131_v22 = vld [vmem:[%s781_s3 + $0x68] sm:$0xff]  ;;  %v130_v23 = vld [vmem:[%s781_s3 + $0x60] sm:$0xff]  ;;  %v129_v24 = vld [vmem:[%s781_s3 + $0x58] sm:$0xff] }
   0x9   :  { %201 = vmatpush1.msra.mxu1 %v142_v11  ;;  %v128_v25 = vld [vmem:[%s781_s3 + $0x50] sm:$0xff]  ;;  %v127_v26 = vld [vmem:[%s781_s3 + $0x48] sm:$0xff]  ;;  %v126_v27 = vld [vmem:[%s781_s3 + $0x40] sm:$0xff] }
   0xa   :  { %202 = vmatprep.subr.mxu1 %v141_v12  ;;  %v125_v28 = vld [vmem:[%s781_s3 + $0x38] sm:$0xff]  ;;  %v124_v29 = vld [vmem:[%s781_s3 + $0x30] sm:$0xff]  ;;  %v123_v30 = vld [vmem:[%s781_s3 + $0x28] sm:$0xff] }
   0xb   :  { %203 = vmatpush1.msra.mxu1 %v140_v13  ;;  %v122_v31 = vld [vmem:[%s781_s3 + $0x20] sm:$0xff]  ;;  %v121_v32 = vld [vmem:[%s781_s3 + $0x18] sm:$0xff]  ;;  %v120_v33 = vld [vmem:[%s781_s3 + $0x10] sm:$0xff] }
   0xc   :  { %204 = vmatprep.subr.mxu1 %v139_v14  ;;  %v119_v34 = vld [vmem:[%s781_s3 + $0x8] sm:$0xff]  ;;  %v118_v35 = vld [vmem:[%s781_s3] sm:$0xff]  ;;  %v181_v36 = vld [vmem:[%s781_s3 + $0x1f8] sm:$0xff] }
   0xd   :  { %205 = vmatpush1.msra.mxu1 %v138_v15  ;;  %v180_v37 = vld [vmem:[%s781_s3 + $0x1f0] sm:$0xff]  ;;  %v179_v38 = vld [vmem:[%s781_s3 + $0x1e8] sm:$0xff]  ;;  %v178_v39 = vld [vmem:[%s781_s3 + $0x1e0] sm:$0xff] }
   0xe   :  { %206 = vmatprep.subr.mxu1 %v137_v16  ;;  %v177_v40 = vld [vmem:[%s781_s3 + $0x1d8] sm:$0xff]  ;;  %v176_v41 = vld [vmem:[%s781_s3 + $0x1d0] sm:$0xff]  ;;  %v175_v42 = vld [vmem:[%s781_s3 + $0x1c8] sm:$0xff] }
   0xf   :  { %207 = vmatpush1.msra.mxu1 %v136_v17  ;;  %v174_v43 = vld [vmem:[%s781_s3 + $0x1c0] sm:$0xff]  ;;  %v173_v44 = vld [vmem:[%s781_s3 + $0x1b8] sm:$0xff]  ;;  %v172_v45 = vld [vmem:[%s781_s3 + $0x1b0] sm:$0xff] }
  0x10   :  { %208 = vmatprep.subr.mxu1 %v135_v18  ;;  %v171_v46 = vld [vmem:[%s781_s3 + $0x1a8] sm:$0xff]  ;;  %v170_v47 = vld [vmem:[%s781_s3 + $0x1a0] sm:$0xff]  ;;  %v169_v48 = vld [vmem:[%s781_s3 + $0x198] sm:$0xff] }
  0x11   :  { %209 = vmatpush1.msra.mxu1 %v134_v19  ;;  %v168_v49 = vld [vmem:[%s781_s3 + $0x190] sm:$0xff]  ;;  %v167_v50 = vld [vmem:[%s781_s3 + $0x188] sm:$0xff]  ;;  %v166_v51 = vld [vmem:[%s781_s3 + $0x180] sm:$0xff] }
  0x12   :  { %210 = vmatprep.subr.mxu1 %v133_v20  ;;  %v165_v52 = vld [vmem:[%s781_s3 + $0x178] sm:$0xff]  ;;  %v164_v53 = vld [vmem:[%s781_s3 + $0x170] sm:$0xff]  ;;  %v163_v54 = vld [vmem:[%s781_s3 + $0x168] sm:$0xff] }
  0x13   :  { %211 = vmatpush1.msra.mxu1 %v132_v21  ;;  %v162_v55 = vld [vmem:[%s781_s3 + $0x160] sm:$0xff]  ;;  %v161_v56 = vld [vmem:[%s781_s3 + $0x158] sm:$0xff]  ;;  %v160_v57 = vld [vmem:[%s781_s3 + $0x150] sm:$0xff] }
  0x14   :  { %212 = vmatprep.subr.mxu1 %v131_v22  ;;  %v159_v58 = vld [vmem:[%s781_s3 + $0x148] sm:$0xff]  ;;  %v158_v59 = vld [vmem:[%s781_s3 + $0x140] sm:$0xff]  ;;  %v157_v60 = vld [vmem:[%s781_s3 + $0x138] sm:$0xff] }
  0x15   :  { %213 = vmatpush1.msra.mxu1 %v130_v23  ;;  %v156_v61 = vld [vmem:[%s781_s3 + $0x130] sm:$0xff]  ;;  %v155_v62 = vld [vmem:[%s781_s3 + $0x128] sm:$0xff]  ;;  %v154_v63 = vld [vmem:[%s781_s3 + $0x120] sm:$0xff] }
  0x16   :  { %214 = vmatprep.subr.mxu1 %v129_v24  ;;  %v153_v0 = vld [vmem:[%s781_s3 + $0x118] sm:$0xff]  ;;  %v152_v1 = vld [vmem:[%s781_s3 + $0x110] sm:$0xff]  ;;  %v151_v2 = vld [vmem:[%s781_s3 + $0x108] sm:$0xff] }
  0x17   :  { %215 = vmatpush1.msra.mxu1 %v128_v25  ;;  %v150_v3 = vld [vmem:[%s781_s3 + $0x100] sm:$0xff]  ;;  %v298_v4 = vld [vmem:[%s782_s5 + $0xf8] sm:$0xff]  ;;  %v297_v6 = vld [vmem:[%s782_s5 + $0xf0] sm:$0xff] }
  0x18   :  { %216 = vmatprep.subr.mxu1 %v127_v26  ;;  %v282_v5 = vld [vmem:[%s782_s5 + $0x78] sm:$0xff]  ;;  %391 = vmatprep.subr.mxu0 %v298_v4  ;;  %v281_v7 = vld [vmem:[%s782_s5 + $0x70] sm:$0xff]  ;;  %v296_v8 = vld [vmem:[%s782_s5 + $0xe8] sm:$0xff] }
  0x19   :  { %217 = vmatpush1.msra.mxu1 %v126_v27  ;;  %392 = vmatpush3.msra.mxu0 %v282_v5  ;;  %v280_v9 = vld [vmem:[%s782_s5 + $0x68] sm:$0xff]  ;;  %v295_v10 = vld [vmem:[%s782_s5 + $0xe0] sm:$0xff]  ;;  %v294_v12 = vld [vmem:[%s782_s5 + $0xd8] sm:$0xff] }
  0x1a   :  { %218 = vmatprep.subr.mxu1 %v125_v28  ;;  %393 = vmatprep.subr.mxu0 %v297_v6  ;;  %v279_v11 = vld [vmem:[%s782_s5 + $0x60] sm:$0xff]  ;;  %v278_v13 = vld [vmem:[%s782_s5 + $0x58] sm:$0xff]  ;;  %v293_v14 = vld [vmem:[%s782_s5 + $0xd0] sm:$0xff]  ;;  %v31_v28 = vlaneseq }
  0x1b   :  { %219 = vmatpush1.msra.mxu1 %v124_v29  ;;  %394 = vmatpush3.msra.mxu0 %v281_v7  ;;  %v277_v15 = vld [vmem:[%s782_s5 + $0x50] sm:$0xff]  ;;  %v292_v16 = vld [vmem:[%s782_s5 + $0xc8] sm:$0xff]  ;;  %v291_v18 = vld [vmem:[%s782_s5 + $0xc0] sm:$0xff] }
  0x1c   :  { %220 = vmatprep.subr.mxu1 %v123_v30  ;;  %395 = vmatprep.subr.mxu0 %v296_v8  ;;  %v276_v17 = vld [vmem:[%s782_s5 + $0x48] sm:$0xff]  ;;  %v275_v19 = vld [vmem:[%s782_s5 + $0x40] sm:$0xff]  ;;  %v290_v20 = vld [vmem:[%s782_s5 + $0xb8] sm:$0xff]  ;;  %v32_v29 = vshrl.u32 %v31_v28, 7 }
  0x1d   :  { %221 = vmatpush1.msra.mxu1 %v122_v31  ;;  %396 = vmatpush3.msra.mxu0 %v280_v9  ;;  %v274_v21 = vld [vmem:[%s782_s5 + $0x38] sm:$0xff]  ;;  %v289_v22 = vld [vmem:[%s782_s5 + $0xb0] sm:$0xff]  ;;  %v288_v24 = vld [vmem:[%s782_s5 + $0xa8] sm:$0xff] }
  0x1e   :  { %222 = vmatprep.subr.mxu1 %v121_v32  ;;  %397 = vmatprep.subr.mxu0 %v295_v10  ;;  %v273_v23 = vld [vmem:[%s782_s5 + $0x30] sm:$0xff]  ;;  %v272_v25 = vld [vmem:[%s782_s5 + $0x28] sm:$0xff]  ;;  %v287_v26 = vld [vmem:[%s782_s5 + $0xa0] sm:$0xff]  ;;  %v33_v30 = vsub.s32 0, %v32_v29  ;;  %v37_v32 = vsub.s32 1, %v32_v29 }
  0x1f   :  { %223 = vmatpush1.msra.mxu1 %v120_v33  ;;  %398 = vmatpush3.msra.mxu0 %v279_v11  ;;  %v271_v27 = vld [vmem:[%s782_s5 + $0x20] sm:$0xff] }
  0x20   :  { %224 = vmatprep.subr.mxu1 %v119_v34  ;;  %399 = vmatprep.subr.mxu0 %v294_v12  ;;  %v29_v31 = vld [vmem:[%s783_s2] sm:$0x3] }
  0x21   :  { %225 = vmatpush1.msra.mxu1 %v118_v35  ;;  %400 = vmatpush3.msra.mxu0 %v278_v13  ;;  %v34_v33 = vrot.slane %v29_v31, %v33_v30  ;;  %v38_v34 = vrot.slane %v29_v31, %v37_v32 }
  0x22   :  { %226 = vmatprep.subr.mxu1 %v181_v36  ;;  %401 = vmatprep.subr.mxu0 %v293_v14 }
  0x23   :  { %227 = vmatpush2.msra.mxu1 %v180_v37  ;;  %402 = vmatpush3.msra.mxu0 %v277_v15 }
  0x24   :  { %228 = vmatprep.subr.mxu1 %v179_v38  ;;  %403 = vmatprep.subr.mxu0 %v292_v16 }
  0x25   :  { %229 = vmatpush2.msra.mxu1 %v178_v39  ;;  %404 = vmatpush3.msra.mxu0 %v276_v17 }
  0x26   :  { %230 = vmatprep.subr.mxu1 %v177_v40  ;;  %405 = vmatprep.subr.mxu0 %v291_v18 }
  0x27   :  { %231 = vmatpush2.msra.mxu1 %v176_v41  ;;  %406 = vmatpush3.msra.mxu0 %v275_v19  ;;  %v286_v41 = vld [vmem:[%s782_s5 + $0x98] sm:$0xff] }
  0x28   :  { %232 = vmatprep.subr.mxu1 %v175_v42  ;;  %407 = vmatprep.subr.mxu0 %v290_v20  ;;  %v270_v42 = vld [vmem:[%s782_s5 + $0x18] sm:$0xff] }
  0x29   :  { %233 = vmatpush2.msra.mxu1 %v174_v43  ;;  %408 = vmatpush3.msra.mxu0 %v274_v21  ;;  %v285_v43 = vld [vmem:[%s782_s5 + $0x90] sm:$0xff] }
  0x2a   :  { %234 = vmatprep.subr.mxu1 %v173_v44  ;;  %409 = vmatprep.subr.mxu0 %v289_v22  ;;  %v269_v44 = vld [vmem:[%s782_s5 + $0x10] sm:$0xff] }
  0x2b   :  { %235 = vmatpush2.msra.mxu1 %v172_v45  ;;  %410 = vmatpush3.msra.mxu0 %v273_v23  ;;  %v284_v45 = vld [vmem:[%s782_s5 + $0x88] sm:$0xff] }
  0x2c   :  { %236 = vmatprep.subr.mxu1 %v171_v46  ;;  %411 = vmatprep.subr.mxu0 %v288_v24  ;;  %v268_v46 = vld [vmem:[%s782_s5 + $0x8] sm:$0xff] }
  0x2d   :  { %237 = vmatpush2.msra.mxu1 %v170_v47  ;;  %412 = vmatpush3.msra.mxu0 %v272_v25  ;;  %v283_v47 = vld [vmem:[%s782_s5 + $0x80] sm:$0xff] }
  0x2e   :  { %238 = vmatprep.subr.mxu1 %v169_v48  ;;  %413 = vmatprep.subr.mxu0 %v287_v26  ;;  %v267_v48 = vld [vmem:[%s782_s5] sm:$0xff] }
  0x2f   :  { %239 = vmatpush2.msra.mxu1 %v168_v49  ;;  %414 = vmatpush3.msra.mxu0 %v271_v27  ;;  %v182_v49 = vld [vmem:[%s784_s4] sm:$0x3] }
  0x30   :  { %240 = vmatprep.subr.mxu1 %v167_v50  ;;  %415 = vmatprep.subr.mxu0 %v286_v41  ;;  %v187_v50 = vrot.slane %v182_v49, %v33_v30 }
  0x31   :  { %241 = vmatpush2.msra.mxu1 %v166_v51  ;;  %416 = vmatpush3.msra.mxu0 %v270_v42  ;;  %v191_v51 = vrot.slane %v182_v49, %v37_v32 }
  0x32   :  { %242 = vmatprep.subr.mxu1 %v165_v52  ;;  %417 = vmatprep.subr.mxu0 %v285_v43 }
  0x33   :  { %243 = vmatpush2.msra.mxu1 %v164_v53  ;;  %418 = vmatpush3.msra.mxu0 %v269_v44 }
  0x34   :  { %244 = vmatprep.subr.mxu1 %v163_v54  ;;  %419 = vmatprep.subr.mxu0 %v284_v45 }
  0x35   :  { %245 = vmatpush2.msra.mxu1 %v162_v55  ;;  %420 = vmatpush3.msra.mxu0 %v268_v46 }
  0x36   :  { %246 = vmatprep.subr.mxu1 %v161_v56  ;;  %421 = vmatprep.subr.mxu0 %v283_v47 }
  0x37   :  { %247 = vmatpush2.msra.mxu1 %v160_v57  ;;  %422 = vmatpush3.msra.mxu0 %v267_v48 }
  0x38   :  { %248 = vmatprep.subr.mxu1 %v159_v58 }
  0x39   :  { %249 = vmatpush2.msra.mxu1 %v158_v59  ;;  %v390_v59 = vld [vmem:[%s785_s6] ss:$0 sm:$0xff] }
  0x3a   :  { %250 = vmatprep.subr.mxu1 %v157_v60 }
  0x3b   :  { %251 = vmatpush2.msra.mxu1 %v156_v61 }
  0x3c   :  { %252 = vmatprep.subr.mxu1 %v155_v62 }
  0x3d   :  { %253 = vmatpush2.msra.mxu1 %v154_v63 }
  0x3e   :  { %254 = vmatprep.subr.mxu1 %v153_v0  ;;  %v377_v0 = vand.u32 127, %v31_v28 }
  0x3f   :  { %255 = vmatpush2.msra.mxu1 %v152_v1 }
  0x40   :  { %256 = vmatprep.subr.mxu1 %v151_v2  ;;  %vm382_vm1 = vcmp.eq.s32.totalorder %v377_v0, 1 }
  0x41   :  { %257 = vmatpush2.msra.mxu1 %v150_v3 }
  0xc4   :  { %v111_v35 = vpop.f32.mrf.mxu0 }
  0xc5   :  { %v112_v36 = vadd.f32 %v111_v35, %v34_v33 }
  0xc6   :  { %v113_v37 = vpop.f32.mrf.mxu0 }
  0xc7   :  { %v114_v38 = vadd.f32 %v113_v37, %v38_v34  ;;  %v116_v40 = vmax.f32 %v112_v36, 0.0 }
  0xc9   :  { %v117_v39 = vmax.f32 %v114_v38, 0.0 }
  0xcb   :  { %258 = vmatprep.mubr.f32.mxu1 %v117_v39 }
  0xcc   :  { %259 = vmatmul.mubr.f32.vlgmr.msra.gmra.mxu1 %v116_v40 }
 0x18c   :  { %v260_v52 = vpop.f32.mrf.mxu1 }
 0x18d   :  { %v261_v53 = vadd.f32 %v260_v52, %v187_v50 }
 0x18e   :  { %v262_v54 = vpop.f32.mrf.mxu1 }
 0x18f   :  { %v263_v55 = vadd.f32 %v262_v54, %v191_v51  ;;  %v265_v57 = vmax.f32 %v261_v53, 0.0 }
 0x191   :  { %v266_v56 = vmax.f32 %v263_v55, 0.0 }
 0x193   :  { %370 = vmatprep.mubr.f32.mxu0 %v266_v56 }
 0x194   :  { %371 = vmatmul.mubr.f32.vlgmr.msra.gmra.mxu0 %v265_v57 }
 0x254   :  { %v423_v58 = vpop.f32.mrf.mxu0 }
 0x256   :  { %v424_v60 = vpop.f32.mrf.mxu0 }
 0x257   :  { %v425_v61 = vadd.f32 %v424_v60, %v423_v58 }
 0x259   :  { %v373_v62 = vadd.f32 %v425_v61, %v390_v59 }
 0x25b   :  { %427 = vtanh.f32 %v373_v62 }
 0x268   :  { %v428_v63 = vpop.eup %427 }
 0x269   :  { %v379_v1 = vadd.f32 1.0, %v428_v63 }
 0x26b   :  { %v380_v2 = vmul.f32 3.5, %v379_v1 }
 0x26d   :  { %v381_v3 = vadd.f32 -5.0, %v380_v2 }
 0x26f   :  { %v383_v4 = vsel %vm382_vm1, %v381_v3, %v373_v62 }
 0x270   :  { %384 = vst [vmem:[%s786_s7] sm:$0xff] %v383_v4 }

</bundles_post_ra>
